<compile_context>
chip_gen: v7x
topology: tpu7x:2x2x1
jax: 0.10.0
libtpu: 0.0.40
codegen_flags: <defaults>
</compile_context>

<pallas_src>
import functools
import math

import jax
import jax.numpy as jnp
from jax import lax
from jax.experimental import pallas as pl
from jax.experimental.pallas import tpu as pltpu


_VMEM_LIMIT = 64 * 1024 * 1024


def _row_tile(T, max_tile=512):
    """Largest row tile <= max_tile that divides T (multiple of 8 when tiled)."""
    if T <= max_tile:
        return T
    for t in (512, 256, 128, 64, 32, 16, 8):
        if t <= max_tile and T % t == 0:
            return t
    return T


# ----------------------------------------------------------------------------
# Row-tiled linear kernel: out = x @ W^T + b  (W kept in PyTorch (Cout, Cin))
# ----------------------------------------------------------------------------
def _linear_kernel(x_ref, w_ref, b_ref, o_ref):
    # Contract x's last dim with w's last dim -> no materialized transpose.
    y = lax.dot_general(
        x_ref[...], w_ref[...],
        dimension_numbers=(((1,), (1,)), ((), ())),
        preferred_element_type=jnp.float32)
    o_ref[...] = (y + b_ref[...]).astype(o_ref.dtype)


def pallas_linear(x, w, b, *, max_row_tile=512):
    """x: (T, Cin), w: (Cout, Cin), b: (Cout,) -> (T, Cout)."""
    T, Cin = x.shape
    Cout = w.shape[0]
    tm = _row_tile(T, max_row_tile)
    return pl.pallas_call(
        _linear_kernel,
        out_shape=jax.ShapeDtypeStruct((T, Cout), x.dtype),
        grid=(T // tm,),
        in_specs=[
            pl.BlockSpec((tm, Cin), lambda i: (i, 0)),
            pl.BlockSpec((Cout, Cin), lambda i: (0, 0)),
            pl.BlockSpec((1, Cout), lambda i: (0, 0)),
        ],
        out_specs=pl.BlockSpec((tm, Cout), lambda i: (i, 0)),
        compiler_params=pltpu.CompilerParams(
            dimension_semantics=("parallel",),
            vmem_limit_bytes=_VMEM_LIMIT),
    )(x, w, b.reshape(1, Cout))


# ----------------------------------------------------------------------------
# Fused K/V projection kernel (key and value share (T, C) shape): one launch,
# each activation block DMA'd once, weights fetched once (constant index_map).
# ----------------------------------------------------------------------------
def _kv_projection_kernel(k_ref, v_ref, wk_ref, bk_ref, wv_ref, bv_ref,
                          ko_ref, vo_ref):
    cdims = (((1,), (1,)), ((), ()))
    kp = lax.dot_general(k_ref[...], wk_ref[...], cdims,
                         preferred_element_type=jnp.float32) + bk_ref[...]
    vp = lax.dot_general(v_ref[...], wv_ref[...], cdims,
                         preferred_element_type=jnp.float32) + bv_ref[...]
    ko_ref[...] = kp.astype(ko_ref.dtype)
    vo_ref[...] = vp.astype(vo_ref.dtype)


def pallas_kv_projection(k, v, wk, bk, wv, bv, *, max_row_tile=512):
    """k, v: (T, Cin); wk/wv: (Cout, Cin); bk/bv: (Cout,) -> K, V: (T, Cout)."""
    T, Cin = k.shape
    Cout = wk.shape[0]
    tm = _row_tile(T, max_row_tile)
    row_spec = pl.BlockSpec((tm, Cin), lambda i: (i, 0))
    w_spec = pl.BlockSpec((Cout, Cin), lambda i: (0, 0))
    b_spec = pl.BlockSpec((1, Cout), lambda i: (0, 0))
    out_spec = pl.BlockSpec((tm, Cout), lambda i: (i, 0))
    return pl.pallas_call(
        _kv_projection_kernel,
        out_shape=(
            jax.ShapeDtypeStruct((T, Cout), k.dtype),
            jax.ShapeDtypeStruct((T, Cout), v.dtype),
        ),
        grid=(T // tm,),
        in_specs=[row_spec, row_spec, w_spec, b_spec, w_spec, b_spec],
        out_specs=(out_spec, out_spec),
        compiler_params=pltpu.CompilerParams(
            dimension_semantics=("parallel",),
            vmem_limit_bytes=_VMEM_LIMIT),
    )(k, v, wk, bk.reshape(1, Cout), wv, bv.reshape(1, Cout))


# ----------------------------------------------------------------------------
# Attention kernel: one grid step per batch element, all heads processed in the
# kernel (heads sliced from the channel axis, so no (B,M,H,D)->(B,H,M,D)
# transposes are needed anywhere). Output written directly into (B, M, C).
# Q already carries the 1/sqrt(d) scale (folded into the projection).
# ----------------------------------------------------------------------------
def _attention_kernel(q_ref, k_ref, v_ref, o_ref, attn_ref, *,
                      num_heads, head_dim):
    q = q_ref[0]                                  # (M, C), pre-scaled
    k = k_ref[0]                                  # (L, C)
    v = v_ref[0]                                  # (L, C)

    cdims = (((1,), (1,)), ((), ()))              # contract last dims (no k.T)
    outs = []
    for h in range(num_heads):                    # static unrolled head loop
        lo = h * head_dim
        hi = lo + head_dim
        qh = q[:, lo:hi]                          # (M, D)
        kh = k[:, lo:hi]                          # (L, D)
        vh = v[:, lo:hi]                          # (L, D)

        s = lax.dot_general(qh, kh, cdims,
                            preferred_element_type=jnp.float32)   # (M, L)
        m = jnp.max(s, axis=-1, keepdims=True)
        p = jnp.exp(s - m)
        denom = jnp.sum(p, axis=-1, keepdims=True)
        attn = p * pl.reciprocal(denom, approx=True)              # EUP slot

        attn_ref[0, h] = attn.astype(attn_ref.dtype)
        outs.append(jnp.dot(attn.astype(vh.dtype), vh,
                            preferred_element_type=jnp.float32))  # (M, D)

    # Single lane-dense store of the whole (M, C) context tile.
    o_ref[0] = jnp.concatenate(outs, axis=-1).astype(o_ref.dtype)


def pallas_attention(q, k, v, num_heads):
    """q: (B, M, C), k/v: (B, L, C) -> (ctx (B, M, C), attn (B, H, M, L))."""
    B, M, C = q.shape
    L = k.shape[1]
    head_dim = C // num_heads
    kernel = functools.partial(_attention_kernel,
                               num_heads=num_heads, head_dim=head_dim)
    # TODO(synk): for realistic M*L (e.g. 2048^2) the per-batch f32 attention
    # block should be L-tiled (online softmax) to respect v7x's 64 MiB VMEM.
    return pl.pallas_call(
        kernel,
        out_shape=(
            jax.ShapeDtypeStruct((B, M, C), q.dtype),
            jax.ShapeDtypeStruct((B, num_heads, M, L), jnp.float32),
        ),
        grid=(B,),
        in_specs=[
            pl.BlockSpec((1, M, C), lambda b: (b, 0, 0)),
            pl.BlockSpec((1, L, C), lambda b: (b, 0, 0)),
            pl.BlockSpec((1, L, C), lambda b: (b, 0, 0)),
        ],
        out_specs=(
            pl.BlockSpec((1, M, C), lambda b: (b, 0, 0)),
            pl.BlockSpec((1, num_heads, M, L), lambda b: (b, 0, 0, 0)),
        ),
        compiler_params=pltpu.CompilerParams(
            dimension_semantics=("parallel",),
            vmem_limit_bytes=_VMEM_LIMIT),
    )(q, k, v)


# ----------------------------------------------------------------------------
# Module-level wrapper mirroring MultiHeadAttention.forward
# ----------------------------------------------------------------------------
def multi_head_attention(params, query, key, value, num_heads):
    B, N, HW, C = value.shape
    _, M, _ = query.shape
    head_dim = C // num_heads
    L = N * HW
    scale = 1.0 / math.sqrt(head_dim)

    # Fold the softmax 1/sqrt(d) scale into the Q projection (free at runtime).
    wq_s = params["wq"] * scale
    bq_s = params["bq"] * scale

    Q = pallas_linear(query.reshape(B * M, C), wq_s, bq_s).reshape(B, M, C)
    K, V = pallas_kv_projection(
        key.reshape(B * L, C), value.reshape(B * L, C),
        params["wk"], params["bk"], params["wv"], params["bv"])
    K = K.reshape(B, L, C)
    V = V.reshape(B, L, C)

    # Attention kernel slices heads internally: no (B,T,H,D) transposes needed.
    ctx, attention = pallas_attention(Q, K, V, num_heads)

    out = pallas_linear(ctx.reshape(B * M, C), params["wo"], params["bo"])
    return out.reshape(B, M, C), attention


# Pure-JAX reference (mirrors the PyTorch module exactly).
def reference(params, query, key, value, num_heads):
    B, N, HW, C = value.shape
    _, M, _ = query.shape
    head_dim = C // num_heads
    L = N * HW

    def lin(x, w, b):
        return x @ w.T + b

    Q = lin(query, params["wq"], params["bq"])
    K = lin(key.reshape(B, L, C), params["wk"], params["bk"])
    V = lin(value.reshape(B, L, C), params["wv"], params["bv"])
    Q = Q.reshape(B, M, num_heads, head_dim).transpose(0, 2, 1, 3)
    K = K.reshape(B, L, num_heads, head_dim).transpose(0, 2, 1, 3)
    V = V.reshape(B, L, num_heads, head_dim).transpose(0, 2, 1, 3)
    s = jnp.einsum("bhmd,bhld->bhml", Q, K) / math.sqrt(head_dim)
    attn = jax.nn.softmax(s, axis=-1)
    out = jnp.einsum("bhml,bhld->bhmd", attn, V)
    out = out.transpose(0, 2, 1, 3).reshape(B, M, C)
    out = lin(out, params["wo"], params["bo"])
    return out, attn


if __name__ == "__main__":
    # Small deterministic configuration.
    B, N, HW, C = 2, 2, 16, 32       # value: (B, N, HW, C), L = N*HW = 32
    M = 8                            # query length
    num_heads = 4                    # head_dim = 8

    key_rng = jax.random.PRNGKey(0)
    ks = jax.random.split(key_rng, 11)

    def init_linear(kw, kb, fan_in, fan_out):
        bound = 1.0 / math.sqrt(fan_in)
        w = jax.random.uniform(kw, (fan_out, fan_in), jnp.float32, -bound, bound)
        b = jax.random.uniform(kb, (fan_out,), jnp.float32, -bound, bound)
        return w, b

    wq, bq = init_linear(ks[0], ks[1], C, C)
    wk, bk = init_linear(ks[2], ks[3], C, C)
    wv, bv = init_linear(ks[4], ks[5], C, C)
    wo, bo = init_linear(ks[6], ks[7], C, C)
    params = dict(wq=wq, bq=bq, wk=wk, bk=bk, wv=wv, bv=bv, wo=wo, bo=bo)

    query = jax.random.normal(ks[8], (B, M, C), jnp.float32)
    key_in = jax.random.normal(ks[9], (B, N, HW, C), jnp.float32)
    value_in = jax.random.normal(ks[10], (B, N, HW, C), jnp.float32)

    out, attn = multi_head_attention(params, query, key_in, value_in, num_heads)
    out = jax.block_until_ready(out)
    attn = jax.block_until_ready(attn)

    out_ref, attn_ref = reference(params, query, key_in, value_in, num_heads)
    assert out.shape == (B, M, C)
    assert attn.shape == (B, num_heads, M, N * HW)
    # Tolerances loosened slightly for the approx EUP reciprocal in the softmax.
    assert jnp.allclose(attn, attn_ref, atol=5e-3, rtol=5e-3)
    assert jnp.allclose(out, out_ref, atol=5e-3, rtol=5e-3)

    # TODO(synk): forward_split uses torch.randint-driven gather; only the
    # deterministic forward() path is implemented here.
    print("KERNEL_OK")
</pallas_src>

<mosaic_0001>
module attributes {stable_mosaic.version = 11 : i64} {
  func.func @_linear_kernel(%arg0: i32, %arg1: memref<16x32xf32, #tpu.memory_space<vmem>>, %arg2: memref<32x32xf32, #tpu.memory_space<vmem>>, %arg3: memref<1x32xf32, #tpu.memory_space<vmem>>, %arg4: memref<16x32xf32, #tpu.memory_space<vmem>>) attributes {dimension_semantics = [#tpu.dimension_semantics<parallel>], iteration_bounds = array<i64: 1>, scalar_prefetch = 0 : i64, scratch_operands = 0 : i64, tpu.core_type = #tpu.core_type<tc>, window_params = [{transform_indices = @transform_0, window_bounds = array<i64: 16, 32>}, {pipeline_mode = #tpu.pipeline_mode<synchronous>, transform_indices = @transform_1, window_bounds = array<i64: 32, 32>}, {pipeline_mode = #tpu.pipeline_mode<synchronous>, transform_indices = @transform_2, window_bounds = array<i64: 1, 32>}, {transform_indices = @transform_3, window_bounds = array<i64: 16, 32>}]} {
    %c0 = arith.constant 0 : index
    %c0_0 = arith.constant 0 : index
    %0 = vector.load %arg1[%c0, %c0_0] : memref<16x32xf32, #tpu.memory_space<vmem>>, vector<16x32xf32>
    %c0_1 = arith.constant 0 : index
    %c0_2 = arith.constant 0 : index
    %1 = vector.load %arg2[%c0_1, %c0_2] : memref<32x32xf32, #tpu.memory_space<vmem>>, vector<32x32xf32>
    %cst = arith.constant dense<0.000000e+00> : vector<16x32xf32>
    %2 = tpu.matmul %0, %1, %cst {dimension_numbers = #tpu.dot_dimension_numbers<[1], [1], [0], [0], [0, 0, 1, 0], [], []>} : vector<16x32xf32>, vector<32x32xf32>, vector<16x32xf32> -> vector<16x32xf32>
    %c0_3 = arith.constant 0 : index
    %c0_4 = arith.constant 0 : index
    %3 = vector.load %arg3[%c0_3, %c0_4] : memref<1x32xf32, #tpu.memory_space<vmem>>, vector<1x32xf32>
    %4 = vector.broadcast %3 : vector<1x32xf32> to vector<16x32xf32>
    %5 = arith.addf %2, %4 : vector<16x32xf32>
    %c0_5 = arith.constant 0 : index
    %c0_6 = arith.constant 0 : index
    %6 = vector.load %arg4[%c0_5, %c0_6] : memref<16x32xf32, #tpu.memory_space<vmem>>, vector<16x32xf32>
    tpu.vector_store %arg4[%c0_5, %c0_6], %5 {strides = array<i32>} : memref<16x32xf32, #tpu.memory_space<vmem>>, vector<16x32xf32>,
    return
  }
  func.func @transform_0(%arg0: i32) -> (i32, i32) {
    %c0_i32 = arith.constant 0 : i32
    %c0_i32_0 = arith.constant 0 : i32
    return %arg0, %c0_i32 : i32, i32
  }
  func.func @transform_1(%arg0: i32) -> (i32, i32) {
    %c0_i32 = arith.constant 0 : i32
    %c0_i32_0 = arith.constant 0 : i32
    %c0_i32_1 = arith.constant 0 : i32
    return %c0_i32, %c0_i32_0 : i32, i32
  }
  func.func @transform_2(%arg0: i32) -> (i32, i32) {
    %c0_i32 = arith.constant 0 : i32
    %c0_i32_0 = arith.constant 0 : i32
    %c0_i32_1 = arith.constant 0 : i32
    return %c0_i32, %c0_i32_0 : i32, i32
  }
  func.func @transform_3(%arg0: i32) -> (i32, i32) {
    %c0_i32 = arith.constant 0 : i32
    %c0_i32_0 = arith.constant 0 : i32
    return %arg0, %c0_i32 : i32, i32
  }
}

</mosaic_0001>

<bundles_post_ra>
// kernel: tpu_custom_call.1
= control target key start
LH: loop header
LB: loop body
LE: loop exit
PB: predicated region body
PF: predicated region fallthrough
CT: control target
= control target key end

     0   :  { %8 = vsyncpa [#allocation3], 0  ;;  %s413_s0 = inlined_call_operand.hbm [shape: f32[16,32], index: 0, kind: input, shape index: {}]   ;;  %s414_s1 = inlined_call_operand.hbm [shape: f32[32,32], index: 1, kind: input, shape index: {}]   ;;  %s415_s2 = inlined_call_operand.hbm [shape: f32[1,32], index: 2, kind: input, shape index: {}]   ;;  %s416_s3 = inlined_call_operand.hbm [shape: f32[16,32], index: 3, kind: output, shape index: {}]  }
   0x1   :  { %9 = vsyncpa [#allocation6], 0 }
   0x2   :  { %10 = vsyncpa [#allocation4], 0  ;;  %s317_s12 = smov [#allocation5]   ;;  %s318_s14 = smov [#allocation2]  }
   0x3   :  { %s28_s13 = sshll.u32 %s317_s12, 4  ;;  %s16_s15 = sshll.u32 %s318_s14, 4  ;;  %s29_s13 = int_to_ptr.vmem [resolvable:$true] %s28_s13  ;;  %s343_s15 = int_to_ptr.vmem [resolvable:$true] %s16_s15 }
   0x4   :  { %s223_s18 = scalar_lea.hbm %s414_s1, 512 }
   0x5   :  { %p224_p0 = scmp.ne.s32.totalorder %s414_s1, %s223_s18  ;;  %p227_p1 = scmp.lt.u32.totalorder %s223_s18, %s414_s1 }
   0x7   :  { %p229_p2 = pnand %p227_p1, %p224_p0 }
   0x9   :  { %232 = shalt.err (!%p229_p2)
}
   0xa   :  { %s233_s23 = scalar_lea.vmem %s29_s13, 512  ;;  %p238_p4 = scmp.lt.s32.totalorder %s29_s13, %s29_s13 }
   0xb   :  { %p234_p3 = scmp.ne.s32.totalorder %s29_s13, %s233_s23  ;;  %p239_p5 = scmp.lt.s32.totalorder %s233_s23, %s233_s23 }
   0xd   :  { %p240_p6 = por %p239_p5, %p238_p4 }
   0xf   :  { %p241_p7 = pnand %p240_p6, %p234_p3 }
  0x11   :  { %244 = shalt.err (!%p241_p7)
}
  0x12   :  { %s319_s24 = smov 128   ;;  %s320_s25 = smov 8  }
  0x13   :  { %34 = dma.hbm_to_vmem [thread:$0]  %s414_s1, 512, %s29_s13, [#allocation6], %s319_s24, %s319_s24, %s320_s25  }
  0x14   :  { %s245_s30 = scalar_lea.hbm %s413_s0, 256 }
  0x15   :  { %p246_p8 = scmp.ne.s32.totalorder %s413_s0, %s245_s30  ;;  %p249_p9 = scmp.lt.u32.totalorder %s245_s30, %s413_s0 }
  0x17   :  { %p251_p10 = pnand %p249_p9, %p246_p8 }
  0x19   :  { %254 = shalt.err (!%p251_p10)
}
  0x1a   :  { %s255_s8 = scalar_lea.vmem %s343_s15, 256  ;;  %p260_p12 = scmp.lt.s32.totalorder %s343_s15, %s343_s15 }
  0x1b   :  { %p256_p11 = scmp.ne.s32.totalorder %s343_s15, %s255_s8  ;;  %p261_p13 = scmp.lt.s32.totalorder %s255_s8, %s255_s8 }
  0x1d   :  { %p262_p0 = por %p261_p13, %p260_p12 }
  0x1f   :  { %p263_p1 = pnand %p262_p0, %p256_p11 }
  0x21   :  { %266 = shalt.err (!%p263_p1)
}
  0x22   :  { %22 = dma.hbm_to_vmem [thread:$0]  %s413_s0, 256, %s343_s15, [#allocation3], %s319_s24, %s319_s24, %s320_s25  }
  0x23   :  { %s321_s10 = smov [#allocation7]   ;;  %s267_s14 = scalar_lea.hbm %s415_s2, 16 }
  0x24   :  { %s41_s11 = sshll.u32 %s321_s10, 4  ;;  %p268_p2 = scmp.ne.s32.totalorder %s415_s2, %s267_s14  ;;  %s42_s11 = int_to_ptr.vmem [resolvable:$true] %s41_s11 }
  0x25   :  { %p271_p3 = scmp.lt.u32.totalorder %s267_s14, %s415_s2 }
  0x27   :  { %p273_p4 = pnand %p271_p3, %p268_p2 }
  0x29   :  { %276 = shalt.err (!%p273_p4)
}
  0x2a   :  { %s277_s20 = scalar_lea.vmem %s42_s11, 16  ;;  %s281_s0 = scalar_lea.vmem %s42_s11, 32 }
  0x2b   :  { %p278_p5 = scmp.ne.s32.totalorder %s42_s11, %s277_s20  ;;  %p282_p6 = scmp.lt.s32.totalorder %s42_s11, %s42_s11 }
  0x2c   :  { %p283_p7 = scmp.lt.s32.totalorder %s281_s0, %s277_s20 }
  0x2e   :  { %p284_p8 = por %p283_p7, %p282_p6 }
  0x30   :  { %p285_p9 = pnand %p284_p8, %p278_p5 }
  0x32   :  { %288 = shalt.err (!%p285_p9)
}
  0x33   :  { %44 = dma.hbm_to_vmem [thread:$0]  %s415_s2, 16, %s42_s11, [#allocation6]  }
  0x34   :  { %311 = dma.done.wait [#allocation3], 256  }
  0x35   :  { %312 = vsyncadd [#allocation3], 4294967040 }
  0x36   :  { %313 = dma.done.wait [#allocation6], 528  }
  0x37   :  { %314 = vsyncadd [#allocation6], 4294966768  ;;  %vm67_vm0 = vcmask 261120   ;;  %v56_v0 = vld [vmem:[#allocation5] sm:$0xff]  ;;  %v57_v1 = vld [vmem:[#allocation5 + $0x8] sm:$0xff]  ;;  %s322_s2 = smov [#allocation8]  }
  0x38   :  { %vm206_vm1 = vmpackc.low %vm67_vm0, %vm67_vm0  ;;  %v58_v2 = vld [vmem:[#allocation5 + $0x10] sm:$0xff]  ;;  %v205_v3 = vpack.c.bf16 %v57_v1, %v56_v0  ;;  %v59_v4 = vld [vmem:[#allocation5 + $0x18] sm:$0xff]  ;;  %s168_s22 = sshll.u32 %s322_s2, 4  ;;  %s169_s22 = int_to_ptr.vmem [resolvable:$true] %s168_s22 }
  0x39   :  { %v54_v5 = vld [vmem:[#allocation2] sm:$0xff]  ;;  %v211_v6 = vpack.c.bf16 %v59_v4, %v58_v2  ;;  %v55_v7 = vld [vmem:[#allocation2 + $0x8] sm:$0xff]  ;;  %v181_v8 = vld [vmem:[#allocation7] ss:$0 sm:$0xff]  ;;  %s289_s23 = scalar_lea.vmem %s169_s22, 256  ;;  %p294_p11 = scmp.lt.s32.totalorder %s169_s22, %s169_s22 }
  0x3a   :  { %202 = vmatprep.mubr.msk.f32.mxu0 %vm67_vm0, %v54_v5  ;;  %207 = vmatprep.subr.msk.bf16.mxu0 %vm206_vm1, %v205_v3  ;;  %p290_p10 = scmp.ne.s32.totalorder %s169_s22, %s289_s23  ;;  %p295_p12 = scmp.lt.s32.totalorder %s289_s23, %s289_s23 }
  0x3b   :  { %210 = vmatpush3.bf16.xpose.msk.msra.mxu0 %vm206_vm1, %v205_v3 }
  0x3c   :  { %213 = vmatprep.subr.msk.bf16.mxu0 %vm206_vm1, %v211_v6  ;;  %p296_p13 = por %p295_p12, %p294_p11 }
  0x3e   :  { %p297_p0 = pnand %p296_p13, %p290_p10 }
  0x43   :  { %216 = vmatpush3.bf16.xpose.msk.msra.mxu0 %vm206_vm1, %v211_v6 }
  0x4a   :  { %203 = vmatmul.mubr.msk.f32.vlgmr.msra.gmra.mrb[0].mxu0 %vm67_vm0, %v55_v7 }
 0x11d   :  { %v204_v9 = vpop.f32.mrb[0].mxu0 }
 0x11e   :  { %v158_v10 = vadd.f32 %v204_v9, %v181_v8  ;;  %v152_v11 = vpop.f32.mrb[1].mxu0 }
 0x11f   :  { %v153_v12 = vadd.f32 %v181_v8, %v152_v11 }
 0x120   :  { %162 = vst.msk [vmem:[#allocation8 + $0x8] sm:$0xff] %vm67_vm0, %v158_v10 }
 0x121   :  { %161 = vst.msk [vmem:[#allocation8] sm:$0xff] %vm67_vm0, %v153_v12 }
 0x122   :  { %300 = shalt.err (!%p297_p0)
}
 0x123   :  { %s301_s28 = scalar_lea.hbm %s416_s3, 256 }
 0x124   :  { %p302_p1 = scmp.ne.s32.totalorder %s416_s3, %s301_s28  ;;  %p305_p2 = scmp.lt.u32.totalorder %s301_s28, %s416_s3 }
 0x126   :  { %p307_p3 = pnand %p305_p2, %p302_p1 }
 0x128   :  { %310 = shalt.err (!%p307_p3)
}
 0x129   :  { %174 = dma.vmem_to_hbm [thread:$0]  %s169_s22, 256, %s416_s3, [#allocation4], %s319_s24, %s319_s24, %s320_s25  }
 0x12a   :  { %315 = dma.done.wait [#allocation4], 256  }
 0x12b   :  { %316 = vsyncadd [#allocation4], 4294967040 }
 0x12c   :  { %178 = vsyncpa [#allocation3], 1 }
 0x12d   :  { %179 = vsyncpa [#allocation6], 1 }
 0x12e   :  { %180 = vsyncpa [#allocation4], 1 }

</bundles_post_ra>
